<compile_context>
chip_gen: v6e
topology: v6e:2x2x1
jax: 0.10.0
libtpu: 0.0.40
codegen_flags: <defaults>
</compile_context>

<pallas_src>
import functools

import jax
import jax.numpy as jnp
from jax.experimental import pallas as pl
from jax.experimental.pallas import tpu as pltpu


def block_kernel(x_ref, wq_ref, wk_ref, wv_ref, wp_ref, bp_ref,
                 g1_ref, b1_ref, g2_ref, b2_ref,
                 w1_ref, bf1_ref, w2_ref, bf2_ref,
                 o_ref, *, n_head, head_size, seq_len, dot_dtype):
    eps = 1e-5
    M, C = x_ref.shape                 # M = (batch elements in this block) * T
    T = seq_len
    Bb = M // T

    x = x_ref[...].astype(jnp.float32)

    def layernorm(v, gamma_ref, beta_ref):
        mu = jnp.mean(v, axis=-1, keepdims=True)
        var = jnp.mean((v - mu) ** 2, axis=-1, keepdims=True)
        return (v - mu) * jax.lax.rsqrt(var + eps) * gamma_ref[...] + beta_ref[...]

    def matmul(a, w_ref):              # batch-folded (M, .) x (., .) matmul
        return jnp.dot(a.astype(dot_dtype), w_ref[...].astype(dot_dtype),
                       preferred_element_type=jnp.float32)

    # ---- ln1 + multi-head causal self-attention -----------------------------
    xn = layernorm(x, g1_ref, b1_ref)
    q = matmul(xn, wq_ref) * (1.0 / (head_size ** 0.5))   # scale folded into q
    k = matmul(xn, wk_ref)
    v = matmul(xn, wv_ref)

    # (Bb, T, C) views: leading-dim split only, minor (lane) dim untouched.
    q3 = q.reshape(Bb, T, C)
    k3 = k.reshape(Bb, T, C)
    v3 = v.reshape(Bb, T, C)

    row = jax.lax.broadcasted_iota(jnp.int32, (T, T), 0)
    col = jax.lax.broadcasted_iota(jnp.int32, (T, T), 1)
    causal = row >= col                                   # broadcasts over Bb

    sa = jnp.zeros((M, C), jnp.float32)
    for h in range(n_head):            # n_head is small; unrolled at trace time
        sl = slice(h * head_size, (h + 1) * head_size)
        qh, kh, vh = q3[:, :, sl], k3[:, :, sl], v3[:, :, sl]
        s = jnp.einsum('btd,bsd->bts', qh.astype(dot_dtype), kh.astype(dot_dtype),
                       preferred_element_type=jnp.float32)
        s = jnp.where(causal, s, -jnp.inf)
        s = s - jnp.max(s, axis=-1, keepdims=True)
        p = jnp.exp(s)
        denom = jnp.sum(p, axis=-1, keepdims=True)
        oh = jnp.einsum('bts,bsd->btd', p.astype(dot_dtype), vh.astype(dot_dtype),
                        preferred_element_type=jnp.float32)
        # Deferred softmax normalization; approx reciprocal runs on the EUP.
        oh = oh * pl.reciprocal(denom, approx=True)
        # Fold the output projection into the head loop (no concatenate):
        #   concat(heads) @ Wp == sum_h head_h @ Wp[h*hs:(h+1)*hs, :]
        sa = sa + jnp.dot(oh.reshape(M, head_size).astype(dot_dtype),
                          wp_ref[sl, :].astype(dot_dtype),
                          preferred_element_type=jnp.float32)

    x1 = x + sa + bp_ref[...]          # first residual (+ projection bias)

    # ---- ln2 + feed-forward --------------------------------------------------
    x1n = layernorm(x1, g2_ref, b2_ref)
    h1 = jnp.maximum(matmul(x1n, w1_ref) + bf1_ref[...], 0.0)   # ReLU
    ff = matmul(h1, w2_ref) + bf2_ref[...]

    o_ref[...] = (x1 + ff).astype(o_ref.dtype)   # second residual


def transformer_block(x, params, n_head, *, batch_block=None,
                      dot_dtype=jnp.float32):
    B, T, C = x.shape
    head_size = C // n_head

    if batch_block is None:
        # Small batch: a single grid step (per-step pipeline overhead dominates
        # tiny blocks).  Larger batch: keep two "parallel" blocks so v7x's two
        # TensorCores both get work via megacore sharding.
        if B >= 8 and B % 2 == 0 and ((B // 2) * T) % 8 == 0:
            batch_block = B // 2
        else:
            batch_block = B
    assert B % batch_block == 0
    m_blk = batch_block * T
    assert m_blk == B * T or m_blk % 8 == 0, "block sublane dim must be 8-aligned"

    # Fold batch into the matmul M dimension (free row-major reshape in HBM).
    x2 = x.reshape(B * T, C)

    kernel = functools.partial(block_kernel, n_head=n_head, head_size=head_size,
                               seq_len=T, dot_dtype=dot_dtype)

    def weight_spec(p):
        # Whole weight resident in VMEM; block index never changes.
        # TODO(synk): at production sizes single-buffer these (pl.Buffered(1))
        # or pack them into one buffer so 13 constant inputs are not
        # double-buffered; also set vmem_limit_bytes (16 MiB default on v5e).
        return pl.BlockSpec(p.shape, lambda b, _n=p.ndim: (0,) * _n)

    in_specs = [pl.BlockSpec((m_blk, C), lambda b: (b, 0))]
    in_specs += [weight_spec(p) for p in params]

    out = pl.pallas_call(
        kernel,
        out_shape=jax.ShapeDtypeStruct((B * T, C), x.dtype),
        grid=(B // batch_block,),
        in_specs=in_specs,
        out_specs=pl.BlockSpec((m_blk, C), lambda b: (b, 0)),
        compiler_params=pltpu.CompilerParams(
            dimension_semantics=("parallel",)),
    )(x2, *params)
    return out.reshape(B, T, C)


def reference_block(x, params, n_head):
    """Pure-JAX reference mirroring the PyTorch Block forward."""
    (wq, wk, wv, wp, bp, g1, b1, g2, b2, w1, bf1, w2, bf2) = params
    B, T, C = x.shape
    hs = C // n_head
    eps = 1e-5

    def ln(v, g, b):
        mu = jnp.mean(v, axis=-1, keepdims=True)
        var = jnp.mean((v - mu) ** 2, axis=-1, keepdims=True)
        return (v - mu) / jnp.sqrt(var + eps) * g[0] + b[0]

    xn = ln(x, g1, b1)
    q = xn @ wq
    k = xn @ wk
    v = xn @ wv
    mask = jnp.tril(jnp.ones((T, T), bool))
    outs = []
    for h in range(n_head):
        sl = slice(h * hs, (h + 1) * hs)
        s = (q[..., sl] @ jnp.swapaxes(k[..., sl], -2, -1)) / (hs ** 0.5)
        s = jnp.where(mask, s, -jnp.inf)
        w = jax.nn.softmax(s, axis=-1)
        outs.append(w @ v[..., sl])
    cat = jnp.concatenate(outs, axis=-1)
    x1 = x + (cat @ wp + bp[0])
    x1n = ln(x1, g2, b2)
    ff = jnp.maximum(x1n @ w1 + bf1[0], 0.0) @ w2 + bf2[0]
    return x1 + ff


if __name__ == "__main__":
    B, T, C, n_head = 2, 8, 32, 4          # block_size == T
    key = jax.random.PRNGKey(0)
    ks = jax.random.split(key, 8)

    x = jax.random.normal(ks[0], (B, T, C), jnp.float32)

    def w(k, shape, scale=0.1):
        return scale * jax.random.normal(k, shape, jnp.float32)

    wq = w(ks[1], (C, C))                   # stacked per-head query/key/value
    wk = w(ks[2], (C, C))
    wv = w(ks[3], (C, C))
    wp = w(ks[4], (C, C))                   # output projection
    bp = w(ks[5], (1, C), 0.05)
    g1 = jnp.ones((1, C), jnp.float32)      # LayerNorm defaults
    b1 = jnp.zeros((1, C), jnp.float32)
    g2 = jnp.ones((1, C), jnp.float32)
    b2 = jnp.zeros((1, C), jnp.float32)
    w1 = w(ks[6], (C, 4 * C))               # FeedForward
    bf1 = jnp.zeros((1, 4 * C), jnp.float32)
    w2 = w(ks[7], (4 * C, C))
    bf2 = jnp.zeros((1, C), jnp.float32)

    params = (wq, wk, wv, wp, bp, g1, b1, g2, b2, w1, bf1, w2, bf2)

    out = transformer_block(x, params, n_head)
    out = jax.block_until_ready(out)

    ref = reference_block(x, params, n_head)
    assert out.shape == (B, T, C)
    # Slightly looser than pure-f32 because the softmax denominator uses the
    # EUP approximate reciprocal (~2^-12 relative error).
    assert jnp.allclose(out, ref, atol=1e-3, rtol=1e-3), "mismatch vs reference"

    print("KERNEL_OK")
</pallas_src>

<mosaic_0001>
module attributes {stable_mosaic.version = 11 : i64} {
  func.func @block_kernel(%arg0: i32, %arg1: memref<16x32xf32, #tpu.memory_space<vmem>>, %arg2: memref<32x32xf32, #tpu.memory_space<vmem>>, %arg3: memref<32x32xf32, #tpu.memory_space<vmem>>, %arg4: memref<32x32xf32, #tpu.memory_space<vmem>>, %arg5: memref<32x32xf32, #tpu.memory_space<vmem>>, %arg6: memref<1x32xf32, #tpu.memory_space<vmem>>, %arg7: memref<1x32xf32, #tpu.memory_space<vmem>>, %arg8: memref<1x32xf32, #tpu.memory_space<vmem>>, %arg9: memref<1x32xf32, #tpu.memory_space<vmem>>, %arg10: memref<1x32xf32, #tpu.memory_space<vmem>>, %arg11: memref<32x128xf32, #tpu.memory_space<vmem>>, %arg12: memref<1x128xf32, #tpu.memory_space<vmem>>, %arg13: memref<128x32xf32, #tpu.memory_space<vmem>>, %arg14: memref<1x32xf32, #tpu.memory_space<vmem>>, %arg15: memref<16x32xf32, #tpu.memory_space<vmem>>) attributes {dimension_semantics = [#tpu.dimension_semantics<parallel>], iteration_bounds = array<i64: 1>, scalar_prefetch = 0 : i64, scratch_operands = 0 : i64, tpu.core_type = #tpu.core_type<tc>, window_params = [{transform_indices = @transform_0, window_bounds = array<i64: 16, 32>}, {pipeline_mode = #tpu.pipeline_mode<synchronous>, transform_indices = @transform_1, window_bounds = array<i64: 32, 32>}, {pipeline_mode = #tpu.pipeline_mode<synchronous>, transform_indices = @transform_2, window_bounds = array<i64: 32, 32>}, {pipeline_mode = #tpu.pipeline_mode<synchronous>, transform_indices = @transform_3, window_bounds = array<i64: 32, 32>}, {pipeline_mode = #tpu.pipeline_mode<synchronous>, transform_indices = @transform_4, window_bounds = array<i64: 32, 32>}, {pipeline_mode = #tpu.pipeline_mode<synchronous>, transform_indices = @transform_5, window_bounds = array<i64: 1, 32>}, {pipeline_mode = #tpu.pipeline_mode<synchronous>, transform_indices = @transform_6, window_bounds = array<i64: 1, 32>}, {pipeline_mode = #tpu.pipeline_mode<synchronous>, transform_indices = @transform_7, window_bounds = array<i64: 1, 32>}, {pipeline_mode = #tpu.pipeline_mode<synchronous>, transform_indices = @transform_8, window_bounds = array<i64: 1, 32>}, {pipeline_mode = #tpu.pipeline_mode<synchronous>, transform_indices = @transform_9, window_bounds = array<i64: 1, 32>}, {pipeline_mode = #tpu.pipeline_mode<synchronous>, transform_indices = @transform_10, window_bounds = array<i64: 32, 128>}, {pipeline_mode = #tpu.pipeline_mode<synchronous>, transform_indices = @transform_11, window_bounds = array<i64: 1, 128>}, {pipeline_mode = #tpu.pipeline_mode<synchronous>, transform_indices = @transform_12, window_bounds = array<i64: 128, 32>}, {pipeline_mode = #tpu.pipeline_mode<synchronous>, transform_indices = @transform_13, window_bounds = array<i64: 1, 32>}, {transform_indices = @transform_14, window_bounds = array<i64: 16, 32>}]} {
    %c0 = arith.constant 0 : index
    %c0_0 = arith.constant 0 : index
    %0 = vector.load %arg1[%c0, %c0_0] : memref<16x32xf32, #tpu.memory_space<vmem>>, vector<16x32xf32>
    %cst = arith.constant dense<0.000000e+00> : vector<16xf32>
    %1 = vector.multi_reduction <add>, %0, %cst [1] : vector<16x32xf32> to vector<16xf32>
    %2 = vector.shape_cast %1 : vector<16xf32> to vector<16x1xf32>
    %cst_1 = arith.constant 3.200000e+01 : f32
    %3 = vector.broadcast %cst_1 : f32 to vector<16x1xf32>
    %4 = arith.divf %2, %3 : vector<16x1xf32>
    %5 = vector.broadcast %4 : vector<16x1xf32> to vector<16x32xf32>
    %6 = arith.subf %0, %5 : vector<16x32xf32>
    %7 = arith.mulf %6, %6 : vector<16x32xf32>
    %cst_2 = arith.constant dense<0.000000e+00> : vector<16xf32>
    %8 = vector.multi_reduction <add>, %7, %cst_2 [1] : vector<16x32xf32> to vector<16xf32>
    %9 = vector.shape_cast %8 : vector<16xf32> to vector<16x1xf32>
    %cst_3 = arith.constant 3.200000e+01 : f32
    %10 = vector.broadcast %cst_3 : f32 to vector<16x1xf32>
    %11 = arith.divf %9, %10 : vector<16x1xf32>
    %12 = vector.broadcast %4 : vector<16x1xf32> to vector<16x32xf32>
    %13 = arith.subf %0, %12 : vector<16x32xf32>
    %cst_4 = arith.constant 9.99999974E-6 : f32
    %14 = vector.broadcast %cst_4 : f32 to vector<16x1xf32>
    %15 = arith.addf %11, %14 : vector<16x1xf32>
    %16 = math.rsqrt %15 : vector<16x1xf32>
    %17 = vector.broadcast %16 : vector<16x1xf32> to vector<16x32xf32>
    %18 = arith.mulf %13, %17 : vector<16x32xf32>
    %c0_5 = arith.constant 0 : index
    %c0_6 = arith.constant 0 : index
    %19 = vector.load %arg7[%c0_5, %c0_6] : memref<1x32xf32, #tpu.memory_space<vmem>>, vector<1x32xf32>
    %20 = vector.broadcast %19 : vector<1x32xf32> to vector<16x32xf32>
    %21 = arith.mulf %18, %20 : vector<16x32xf32>
    %c0_7 = arith.constant 0 : index
    %c0_8 = arith.constant 0 : index
    %22 = vector.load %arg8[%c0_7, %c0_8] : memref<1x32xf32, #tpu.memory_space<vmem>>, vector<1x32xf32>
    %23 = vector.broadcast %22 : vector<1x32xf32> to vector<16x32xf32>
    %24 = arith.addf %21, %23 : vector<16x32xf32>
    %c0_9 = arith.constant 0 : index
    %c0_10 = arith.constant 0 : index
    %25 = vector.load %arg2[%c0_9, %c0_10] : memref<32x32xf32, #tpu.memory_space<vmem>>, vector<32x32xf32>
    %cst_11 = arith.constant dense<0.000000e+00> : vector<16x32xf32>
    %26 = tpu.matmul %24, %25, %cst_11 {dimension_numbers = #tpu.dot_dimension_numbers<[1], [0], [0], [1], [0, 0, 1, 1], [], []>} : vector<16x32xf32>, vector<32x32xf32>, vector<16x32xf32> -> vector<16x32xf32>
    %cst_12 = arith.constant 0.353553385 : f32
    %27 = vector.broadcast %cst_12 : f32 to vector<16x32xf32>
    %28 = arith.mulf %26, %27 : vector<16x32xf32>
    %c0_13 = arith.constant 0 : index
    %c0_14 = arith.constant 0 : index
    %29 = vector.load %arg3[%c0_13, %c0_14] : memref<32x32xf32, #tpu.memory_space<vmem>>, vector<32x32xf32>
    %cst_15 = arith.constant dense<0.000000e+00> : vector<16x32xf32>
    %30 = tpu.matmul %24, %29, %cst_15 {dimension_numbers = #tpu.dot_dimension_numbers<[1], [0], [0], [1], [0, 0, 1, 1], [], []>} : vector<16x32xf32>, vector<32x32xf32>, vector<16x32xf32> -> vector<16x32xf32>
    %c0_16 = arith.constant 0 : index
    %c0_17 = arith.constant 0 : index
    %31 = vector.load %arg4[%c0_16, %c0_17] : memref<32x32xf32, #tpu.memory_space<vmem>>, vector<32x32xf32>
    %cst_18 = arith.constant dense<0.000000e+00> : vector<16x32xf32>
    %32 = tpu.matmul %24, %31, %cst_18 {dimension_numbers = #tpu.dot_dimension_numbers<[1], [0], [0], [1], [0, 0, 1, 1], [], []>} : vector<16x32xf32>, vector<32x32xf32>, vector<16x32xf32> -> vector<16x32xf32>
    %33 = vector.shape_cast %28 : vector<16x32xf32> to vector<2x8x32xf32>
    %34 = vector.shape_cast %30 : vector<16x32xf32> to vector<2x8x32xf32>
    %35 = vector.shape_cast %32 : vector<16x32xf32> to vector<2x8x32xf32>
    %36 = tpu.iota {dimensions = array<i32: 0>} : vector<8x8xi32>
    %37 = tpu.iota {dimensions = array<i32: 1>} : vector<8x8xi32>
    %38 = arith.cmpi sge, %36, %37 : vector<8x8xi32>
    %cst_19 = arith.constant 0.000000e+00 : f32
    %39 = vector.broadcast %cst_19 : f32 to vector<16x32xf32>
    %40 = vector.extract_strided_slice %33 {offsets = [0, 0, 0], sizes = [2, 8, 8], strides = [1, 1, 1]} : vector<2x8x32xf32> to vector<2x8x8xf32>
    %41 = vector.extract_strided_slice %34 {offsets = [0, 0, 0], sizes = [2, 8, 8], strides = [1, 1, 1]} : vector<2x8x32xf32> to vector<2x8x8xf32>
    %42 = vector.extract_strided_slice %35 {offsets = [0, 0, 0], sizes = [2, 8, 8], strides = [1, 1, 1]} : vector<2x8x32xf32> to vector<2x8x8xf32>
    "tpu.trace_start"() <{level = 10 : i32, message = "btd,bsd->bts"}> : () -> ()
    %cst_20 = arith.constant dense<0.000000e+00> : vector<2x8x8xf32>
    %43 = tpu.matmul %40, %41, %cst_20 {dimension_numbers = #tpu.dot_dimension_numbers<[2], [2], [1], [1], [0, 0, 0, 1, 1, 1], [0], [0]>} : vector<2x8x8xf32>, vector<2x8x8xf32>, vector<2x8x8xf32> -> vector<2x8x8xf32>
    %cst_21 = arith.constant 0xFF800000 : f32
    "tpu.trace_stop"() : () -> ()
    %44 = vector.shape_cast %38 : vector<8x8xi1> to vector<1x8x8xi1>
    %45 = vector.broadcast %44 : vector<1x8x8xi1> to vector<2x8x8xi1>
    %46 = vector.broadcast %cst_21 : f32 to vector<2x8x8xf32>
    %47 = arith.select %45, %43, %46 : vector<2x8x8xi1>, vector<2x8x8xf32>
    %cst_22 = arith.constant dense<0xFF800000> : vector<2x8xf32>
    %48 = vector.multi_reduction <maximumf>, %47, %cst_22 [2] : vector<2x8x8xf32> to vector<2x8xf32>
    %49 = vector.shape_cast %48 : vector<2x8xf32> to vector<2x8x1xf32>
    %50 = vector.broadcast %49 : vector<2x8x1xf32> to vector<2x8x8xf32>
    %51 = arith.subf %47, %50 : vector<2x8x8xf32>
    %52 = math.exp %51 : vector<2x8x8xf32>
    %cst_23 = arith.constant dense<0.000000e+00> : vector<2x8xf32>
    %53 = vector.multi_reduction <add>, %52, %cst_23 [2] : vector<2x8x8xf32> to vector<2x8xf32>
    %54 = vector.shape_cast %53 : vector<2x8xf32> to vector<2x8x1xf32>
    "tpu.trace_start"() <{level = 10 : i32, message = "bts,bsd->btd"}> : () -> ()
    %cst_24 = arith.constant dense<0.000000e+00> : vector<2x8x8xf32>
    %55 = tpu.matmul %52, %42, %cst_24 {dimension_numbers = #tpu.dot_dimension_numbers<[2], [1], [1], [2], [0, 0, 0, 1, 1, 2], [0], [0]>} : vector<2x8x8xf32>, vector<2x8x8xf32>, vector<2x8x8xf32> -> vector<2x8x8xf32>
    "tpu.trace_stop"() : () -> ()
    %56 = tpu.reciprocal %54 {approx = true} : vector<2x8x1xf32> -> vector<2x8x1xf32>
    %57 = vector.broadcast %56 : vector<2x8x1xf32> to vector<2x8x8xf32>
    %58 = arith.mulf %55, %57 : vector<2x8x8xf32>
    %59 = vector.shape_cast %58 : vector<2x8x8xf32> to vector<16x8xf32>
    %c0_25 = arith.constant 0 : index
    %c0_26 = arith.constant 0 : index
    %60 = vector.load %arg5[%c0_25, %c0_26] : memref<32x32xf32, #tpu.memory_space<vmem>>, vector<8x32xf32>
    %cst_27 = arith.constant dense<0.000000e+00> : vector<16x32xf32>
    %61 = tpu.matmul %59, %60, %cst_27 {dimension_numbers = #tpu.dot_dimension_numbers<[1], [0], [0], [1], [0, 0, 1, 1], [], []>} : vector<16x8xf32>, vector<8x32xf32>, vector<16x32xf32> -> vector<16x32xf32>
    %62 = arith.addf %39, %61 : vector<16x32xf32>
    %63 = vector.extract_strided_slice %33 {offsets = [0, 0, 8], sizes = [2, 8, 8], strides = [1, 1, 1]} : vector<2x8x32xf32> to vector<2x8x8xf32>
    %64 = vector.extract_strided_slice %34 {offsets = [0, 0, 8], sizes = [2, 8, 8], strides = [1, 1, 1]} : vector<2x8x32xf32> to vector<2x8x8xf32>
    %65 = vector.extract_strided_slice %35 {offsets = [0, 0, 8], sizes = [2, 8, 8], strides = [1, 1, 1]} : vector<2x8x32xf32> to vector<2x8x8xf32>
    "tpu.trace_start"() <{level = 10 : i32, message = "btd,bsd->bts"}> : () -> ()
    %cst_28 = arith.constant dense<0.000000e+00> : vector<2x8x8xf32>
    %66 = tpu.matmul %63, %64, %cst_28 {dimension_numbers = #tpu.dot_dimension_numbers<[2], [2], [1], [1], [0, 0, 0, 1, 1, 1], [0], [0]>} : vector<2x8x8xf32>, vector<2x8x8xf32>, vector<2x8x8xf32> -> vector<2x8x8xf32>
    %cst_29 = arith.constant 0xFF800000 : f32
    "tpu.trace_stop"() : () -> ()
    %67 = vector.shape_cast %38 : vector<8x8xi1> to vector<1x8x8xi1>
    %68 = vector.broadcast %67 : vector<1x8x8xi1> to vector<2x8x8xi1>
    %69 = vector.broadcast %cst_29 : f32 to vector<2x8x8xf32>
    %70 = arith.select %68, %66, %69 : vector<2x8x8xi1>, vector<2x8x8xf32>
    %cst_30 = arith.constant dense<0xFF800000> : vector<2x8xf32>
    %71 = vector.multi_reduction <maximumf>, %70, %cst_30 [2] : vector<2x8x8xf32> to vector<2x8xf32>
    %72 = vector.shape_cast %71 : vector<2x8xf32> to vector<2x8x1xf32>
    %73 = vector.broadcast %72 : vector<2x8x1xf32> to vector<2x8x8xf32>
    %74 = arith.subf %70, %73 : vector<2x8x8xf32>
    %75 = math.exp %74 : vector<2x8x8xf32>
    %cst_31 = arith.constant dense<0.000000e+00> : vector<2x8xf32>
    %76 = vector.multi_reduction <add>, %75, %cst_31 [2] : vector<2x8x8xf32> to vector<2x8xf32>
    %77 = vector.shape_cast %76 : vector<2x8xf32> to vector<2x8x1xf32>
    "tpu.trace_start"() <{level = 10 : i32, message = "bts,bsd->btd"}> : () -> ()
    %cst_32 = arith.constant dense<0.000000e+00> : vector<2x8x8xf32>
    %78 = tpu.matmul %75, %65, %cst_32 {dimension_numbers = #tpu.dot_dimension_numbers<[2], [1], [1], [2], [0, 0, 0, 1, 1, 2], [0], [0]>} : vector<2x8x8xf32>, vector<2x8x8xf32>, vector<2x8x8xf32> -> vector<2x8x8xf32>
    "tpu.trace_stop"() : () -> ()
    %79 = tpu.reciprocal %77 {approx = true} : vector<2x8x1xf32> -> vector<2x8x1xf32>
    %80 = vector.broadcast %79 : vector<2x8x1xf32> to vector<2x8x8xf32>
    %81 = arith.mulf %78, %80 : vector<2x8x8xf32>
    %82 = vector.shape_cast %81 : vector<2x8x8xf32> to vector<16x8xf32>
    %c8 = arith.constant 8 : index
    %c0_33 = arith.constant 0 : index
    %83 = vector.load %arg5[%c8, %c0_33] : memref<32x32xf32, #tpu.memory_space<vmem>>, vector<8x32xf32>
    %cst_34 = arith.constant dense<0.000000e+00> : vector<16x32xf32>
    %84 = tpu.matmul %82, %83, %cst_34 {dimension_numbers = #tpu.dot_dimension_numbers<[1], [0], [0], [1], [0, 0, 1, 1], [], []>} : vector<16x8xf32>, vector<8x32xf32>, vector<16x32xf32> -> vector<16x32xf32>
    %85 = arith.addf %62, %84 : vector<16x32xf32>
    %86 = vector.extract_strided_slice %33 {offsets = [0, 0, 16], sizes = [2, 8, 8], strides = [1, 1, 1]} : vector<2x8x32xf32> to vector<2x8x8xf32>
    %87 = vector.extract_strided_slice %34 {offsets = [0, 0, 16], sizes = [2, 8, 8], strides = [1, 1, 1]} : vector<2x8x32xf32> to vector<2x8x8xf32>
    %88 = vector.extract_strided_slice %35 {offsets = [0, 0, 16], sizes = [2, 8, 8], strides = [1, 1, 1]} : vector<2x8x32xf32> to vector<2x8x8xf32>
    "tpu.trace_start"() <{level = 10 : i32, message = "btd,bsd->bts"}> : () -> ()
    %cst_35 = arith.constant dense<0.000000e+00> : vector<2x8x8xf32>
    %89 = tpu.matmul %86, %87, %cst_35 {dimension_numbers = #tpu.dot_dimension_numbers<[2], [2], [1], [1], [0, 0, 0, 1, 1, 1], [0], [0]>} : vector<2x8x8xf32>, vector<2x8x8xf32>, vector<2x8x8xf32> -> vector<2x8x8xf32>
    %cst_36 = arith.constant 0xFF800000 : f32
    "tpu.trace_stop"() : () -> ()
    %90 = vector.shape_cast %38 : vector<8x8xi1> to vector<1x8x8xi1>
    %91 = vector.broadcast %90 : vector<1x8x8xi1> to vector<2x8x8xi1>
    %92 = vector.broadcast %cst_36 : f32 to vector<2x8x8xf32>
    %93 = arith.select %91, %89, %92 : vector<2x8x8xi1>, vector<2x8x8xf32>
    %cst_37 = arith.constant dense<0xFF800000> : vector<2x8xf32>
    %94 = vector.multi_reduction <maximumf>, %93, %cst_37 [2] : vector<2x8x8xf32> to vector<2x8xf32>
    %95 = vector.shape_cast %94 : vector<2x8xf32> to vector<2x8x1xf32>
    %96 = vector.broadcast %95 : vector<2x8x1xf32> to vector<2x8x8xf32>
    %97 = arith.subf %93, %96 : vector<2x8x8xf32>
    %98 = math.exp %97 : vector<2x8x8xf32>
    %cst_38 = arith.constant dense<0.000000e+00> : vector<2x8xf32>
    %99 = vector.multi_reduction <add>, %98, %cst_38 [2] : vector<2x8x8xf32> to vector<2x8xf32>
    %100 = vector.shape_cast %99 : vector<2x8xf32> to vector<2x8x1xf32>
    "tpu.trace_start"() <{level = 10 : i32, message = "bts,bsd->btd"}> : () -> ()
    %cst_39 = arith.constant dense<0.000000e+00> : vector<2x8x8xf32>
    %101 = tpu.matmul %98, %88, %cst_39 {dimension_numbers = #tpu.dot_dimension_numbers<[2], [1], [1], [2], [0, 0, 0, 1, 1, 2], [0], [0]>} : vector<2x8x8xf32>, vector<2x8x8xf32>, vector<2x8x8xf32> -> vector<2x8x8xf32>
    "tpu.trace_stop"() : () -> ()
    %102 = tpu.reciprocal %100 {approx = true} : vector<2x8x1xf32> -> vector<2x8x1xf32>
    %103 = vector.broadcast %102 : vector<2x8x1xf32> to vector<2x8x8xf32>
    %104 = arith.mulf %101, %103 : vector<2x8x8xf32>
    %105 = vector.shape_cast %104 : vector<2x8x8xf32> to vector<16x8xf32>
    %c16 = arith.constant 16 : index
    %c0_40 = arith.constant 0 : index
    %106 = vector.load %arg5[%c16, %c0_40] : memref<32x32xf32, #tpu.memory_space<vmem>>, vector<8x32xf32>
    %cst_41 = arith.constant dense<0.000000e+00> : vector<16x32xf32>
    %107 = tpu.matmul %105, %106, %cst_41 {dimension_numbers = #tpu.dot_dimension_numbers<[1], [0], [0], [1], [0, 0, 1, 1], [], []>} : vector<16x8xf32>, vector<8x32xf32>, vector<16x32xf32> -> vector<16x32xf32>
    %108 = arith.addf %85, %107 : vector<16x32xf32>
    %109 = vector.extract_strided_slice %33 {offsets = [0, 0, 24], sizes = [2, 8, 8], strides = [1, 1, 1]} : vector<2x8x32xf32> to vector<2x8x8xf32>
    %110 = vector.extract_strided_slice %34 {offsets = [0, 0, 24], sizes = [2, 8, 8], strides = [1, 1, 1]} : vector<2x8x32xf32> to vector<2x8x8xf32>
    %111 = vector.extract_strided_slice %35 {offsets = [0, 0, 24], sizes = [2, 8, 8], strides = [1, 1, 1]} : vector<2x8x32xf32> to vector<2x8x8xf32>
    "tpu.trace_start"() <{level = 10 : i32, message = "btd,bsd->bts"}> : () -> ()
    %cst_42 = arith.constant dense<0.000000e+00> : vector<2x8x8xf32>
    %112 = tpu.matmul %109, %110, %cst_42 {dimension_numbers = #tpu.dot_dimension_numbers<[2], [2], [1], [1], [0, 0, 0, 1, 1, 1], [0], [0]>} : vector<2x8x8xf32>, vector<2x8x8xf32>, vector<2x8x8xf32> -> vector<2x8x8xf32>
    %cst_43 = arith.constant 0xFF800000 : f32
    "tpu.trace_stop"() : () -> ()
    %113 = vector.shape_cast %38 : vector<8x8xi1> to vector<1x8x8xi1>
    %114 = vector.broadcast %113 : vector<1x8x8xi1> to vector<2x8x8xi1>
    %115 = vector.broadcast %cst_43 : f32 to vector<2x8x8xf32>
    %116 = arith.select %114, %112, %115 : vector<2x8x8xi1>, vector<2x8x8xf32>
    %cst_44 = arith.constant dense<0xFF800000> : vector<2x8xf32>
    %117 = vector.multi_reduction <maximumf>, %116, %cst_44 [2] : vector<2x8x8xf32> to vector<2x8xf32>
    %118 = vector.shape_cast %117 : vector<2x8xf32> to vector<2x8x1xf32>
    %119 = vector.broadcast %118 : vector<2x8x1xf32> to vector<2x8x8xf32>
    %120 = arith.subf %116, %119 : vector<2x8x8xf32>
    %121 = math.exp %120 : vector<2x8x8xf32>
    %cst_45 = arith.constant dense<0.000000e+00> : vector<2x8xf32>
    %122 = vector.multi_reduction <add>, %121, %cst_45 [2] : vector<2x8x8xf32> to vector<2x8xf32>
    %123 = vector.shape_cast %122 : vector<2x8xf32> to vector<2x8x1xf32>
    "tpu.trace_start"() <{level = 10 : i32, message = "bts,bsd->btd"}> : () -> ()
    %cst_46 = arith.constant dense<0.000000e+00> : vector<2x8x8xf32>
    %124 = tpu.matmul %121, %111, %cst_46 {dimension_numbers = #tpu.dot_dimension_numbers<[2], [1], [1], [2], [0, 0, 0, 1, 1, 2], [0], [0]>} : vector<2x8x8xf32>, vector<2x8x8xf32>, vector<2x8x8xf32> -> vector<2x8x8xf32>
    "tpu.trace_stop"() : () -> ()
    %125 = tpu.reciprocal %123 {approx = true} : vector<2x8x1xf32> -> vector<2x8x1xf32>
    %126 = vector.broadcast %125 : vector<2x8x1xf32> to vector<2x8x8xf32>
    %127 = arith.mulf %124, %126 : vector<2x8x8xf32>
    %128 = vector.shape_cast %127 : vector<2x8x8xf32> to vector<16x8xf32>
    %c24 = arith.constant 24 : index
    %c0_47 = arith.constant 0 : index
    %129 = vector.load %arg5[%c24, %c0_47] : memref<32x32xf32, #tpu.memory_space<vmem>>, vector<8x32xf32>
    %cst_48 = arith.constant dense<0.000000e+00> : vector<16x32xf32>
    %130 = tpu.matmul %128, %129, %cst_48 {dimension_numbers = #tpu.dot_dimension_numbers<[1], [0], [0], [1], [0, 0, 1, 1], [], []>} : vector<16x8xf32>, vector<8x32xf32>, vector<16x32xf32> -> vector<16x32xf32>
    %131 = arith.addf %108, %130 : vector<16x32xf32>
    %132 = arith.addf %0, %131 : vector<16x32xf32>
    %c0_49 = arith.constant 0 : index
    %c0_50 = arith.constant 0 : index
    %133 = vector.load %arg6[%c0_49, %c0_50] : memref<1x32xf32, #tpu.memory_space<vmem>>, vector<1x32xf32>
    %134 = vector.broadcast %133 : vector<1x32xf32> to vector<16x32xf32>
    %135 = arith.addf %132, %134 : vector<16x32xf32>
    %cst_51 = arith.constant dense<0.000000e+00> : vector<16xf32>
    %136 = vector.multi_reduction <add>, %135, %cst_51 [1] : vector<16x32xf32> to vector<16xf32>
    %137 = vector.shape_cast %136 : vector<16xf32> to vector<16x1xf32>
    %cst_52 = arith.constant 3.200000e+01 : f32
    %138 = vector.broadcast %cst_52 : f32 to vector<16x1xf32>
    %139 = arith.divf %137, %138 : vector<16x1xf32>
    %140 = vector.broadcast %139 : vector<16x1xf32> to vector<16x32xf32>
    %141 = arith.subf %135, %140 : vector<16x32xf32>
    %142 = arith.mulf %141, %141 : vector<16x32xf32>
    %cst_53 = arith.constant dense<0.000000e+00> : vector<16xf32>
    %143 = vector.multi_reduction <add>, %142, %cst_53 [1] : vector<16x32xf32> to vector<16xf32>
    %144 = vector.shape_cast %143 : vector<16xf32> to vector<16x1xf32>
    %cst_54 = arith.constant 3.200000e+01 : f32
    %145 = vector.broadcast %cst_54 : f32 to vector<16x1xf32>
    %146 = arith.divf %144, %145 : vector<16x1xf32>
    %147 = vector.broadcast %139 : vector<16x1xf32> to vector<16x32xf32>
    %148 = arith.subf %135, %147 : vector<16x32xf32>
    %cst_55 = arith.constant 9.99999974E-6 : f32
    %149 = vector.broadcast %cst_55 : f32 to vector<16x1xf32>
    %150 = arith.addf %146, %149 : vector<16x1xf32>
    %151 = math.rsqrt %150 : vector<16x1xf32>
    %152 = vector.broadcast %151 : vector<16x1xf32> to vector<16x32xf32>
    %153 = arith.mulf %148, %152 : vector<16x32xf32>
    %c0_56 = arith.constant 0 : index
    %c0_57 = arith.constant 0 : index
    %154 = vector.load %arg9[%c0_56, %c0_57] : memref<1x32xf32, #tpu.memory_space<vmem>>, vector<1x32xf32>
    %155 = vector.broadcast %154 : vector<1x32xf32> to vector<16x32xf32>
    %156 = arith.mulf %153, %155 : vector<16x32xf32>
    %c0_58 = arith.constant 0 : index
    %c0_59 = arith.constant 0 : index
    %157 = vector.load %arg10[%c0_58, %c0_59] : memref<1x32xf32, #tpu.memory_space<vmem>>, vector<1x32xf32>
    %158 = vector.broadcast %157 : vector<1x32xf32> to vector<16x32xf32>
    %159 = arith.addf %156, %158 : vector<16x32xf32>
    %c0_60 = arith.constant 0 : index
    %c0_61 = arith.constant 0 : index
    %160 = vector.load %arg11[%c0_60, %c0_61] : memref<32x128xf32, #tpu.memory_space<vmem>>, vector<32x128xf32>
    %cst_62 = arith.constant dense<0.000000e+00> : vector<16x128xf32>
    %161 = tpu.matmul %159, %160, %cst_62 {dimension_numbers = #tpu.dot_dimension_numbers<[1], [0], [0], [1], [0, 0, 1, 1], [], []>} : vector<16x32xf32>, vector<32x128xf32>, vector<16x128xf32> -> vector<16x128xf32>
    %c0_63 = arith.constant 0 : index
    %c0_64 = arith.constant 0 : index
    %162 = vector.load %arg12[%c0_63, %c0_64] : memref<1x128xf32, #tpu.memory_space<vmem>>, vector<1x128xf32>
    %163 = vector.broadcast %162 : vector<1x128xf32> to vector<16x128xf32>
    %164 = arith.addf %161, %163 : vector<16x128xf32>
    %cst_65 = arith.constant 0.000000e+00 : f32
    %165 = vector.broadcast %cst_65 : f32 to vector<16x128xf32>
    %166 = arith.maximumf %164, %165 : vector<16x128xf32>
    %c0_66 = arith.constant 0 : index
    %c0_67 = arith.constant 0 : index
    %167 = vector.load %arg13[%c0_66, %c0_67] : memref<128x32xf32, #tpu.memory_space<vmem>>, vector<128x32xf32>
    %cst_68 = arith.constant dense<0.000000e+00> : vector<16x32xf32>
    %168 = tpu.matmul %166, %167, %cst_68 {dimension_numbers = #tpu.dot_dimension_numbers<[1], [0], [0], [1], [0, 0, 1, 1], [], []>} : vector<16x128xf32>, vector<128x32xf32>, vector<16x32xf32> -> vector<16x32xf32>
    %c0_69 = arith.constant 0 : index
    %c0_70 = arith.constant 0 : index
    %169 = vector.load %arg14[%c0_69, %c0_70] : memref<1x32xf32, #tpu.memory_space<vmem>>, vector<1x32xf32>
    %170 = vector.broadcast %169 : vector<1x32xf32> to vector<16x32xf32>
    %171 = arith.addf %168, %170 : vector<16x32xf32>
    %172 = arith.addf %135, %171 : vector<16x32xf32>
    %c0_71 = arith.constant 0 : index
    %c0_72 = arith.constant 0 : index
    %173 = vector.load %arg15[%c0_71, %c0_72] : memref<16x32xf32, #tpu.memory_space<vmem>>, vector<16x32xf32>
    tpu.vector_store %arg15[%c0_71, %c0_72], %172 {strides = array<i32>} : memref<16x32xf32, #tpu.memory_space<vmem>>, vector<16x32xf32>,
    return
  }
  func.func @transform_0(%arg0: i32) -> (i32, i32) {
    %c0_i32 = arith.constant 0 : i32
    %c0_i32_0 = arith.constant 0 : i32
    return %arg0, %c0_i32 : i32, i32
  }
  func.func @transform_1(%arg0: i32) -> (i32, i32) {
    %c0_i32 = arith.constant 0 : i32
    %c0_i32_0 = arith.constant 0 : i32
    %c0_i32_1 = arith.constant 0 : i32
    return %c0_i32, %c0_i32_0 : i32, i32
  }
  func.func @transform_2(%arg0: i32) -> (i32, i32) {
    %c0_i32 = arith.constant 0 : i32
    %c0_i32_0 = arith.constant 0 : i32
    %c0_i32_1 = arith.constant 0 : i32
    return %c0_i32, %c0_i32_0 : i32, i32
  }
  func.func @transform_3(%arg0: i32) -> (i32, i32) {
    %c0_i32 = arith.constant 0 : i32
    %c0_i32_0 = arith.constant 0 : i32
    %c0_i32_1 = arith.constant 0 : i32
    return %c0_i32, %c0_i32_0 : i32, i32
  }
  func.func @transform_4(%arg0: i32) -> (i32, i32) {
    %c0_i32 = arith.constant 0 : i32
    %c0_i32_0 = arith.constant 0 : i32
    %c0_i32_1 = arith.constant 0 : i32
    return %c0_i32, %c0_i32_0 : i32, i32
  }
  func.func @transform_5(%arg0: i32) -> (i32, i32) {
    %c0_i32 = arith.constant 0 : i32
    %c0_i32_0 = arith.constant 0 : i32
    %c0_i32_1 = arith.constant 0 : i32
    return %c0_i32, %c0_i32_0 : i32, i32
  }
  func.func @transform_6(%arg0: i32) -> (i32, i32) {
    %c0_i32 = arith.constant 0 : i32
    %c0_i32_0 = arith.constant 0 : i32
    %c0_i32_1 = arith.constant 0 : i32
    return %c0_i32, %c0_i32_0 : i32, i32
  }
  func.func @transform_7(%arg0: i32) -> (i32, i32) {
    %c0_i32 = arith.constant 0 : i32
    %c0_i32_0 = arith.constant 0 : i32
    %c0_i32_1 = arith.constant 0 : i32
    return %c0_i32, %c0_i32_0 : i32, i32
  }
  func.func @transform_8(%arg0: i32) -> (i32, i32) {
    %c0_i32 = arith.constant 0 : i32
    %c0_i32_0 = arith.constant 0 : i32
    %c0_i32_1 = arith.constant 0 : i32
    return %c0_i32, %c0_i32_0 : i32, i32
  }
  func.func @transform_9(%arg0: i32) -> (i32, i32) {
    %c0_i32 = arith.constant 0 : i32
    %c0_i32_0 = arith.constant 0 : i32
    %c0_i32_1 = arith.constant 0 : i32
    return %c0_i32, %c0_i32_0 : i32, i32
  }
  func.func @transform_10(%arg0: i32) -> (i32, i32) {
    %c0_i32 = arith.constant 0 : i32
    %c0_i32_0 = arith.constant 0 : i32
    %c0_i32_1 = arith.constant 0 : i32
    return %c0_i32, %c0_i32_0 : i32, i32
  }
  func.func @transform_11(%arg0: i32) -> (i32, i32) {
    %c0_i32 = arith.constant 0 : i32
    %c0_i32_0 = arith.constant 0 : i32
    %c0_i32_1 = arith.constant 0 : i32
    return %c0_i32, %c0_i32_0 : i32, i32
  }
  func.func @transform_12(%arg0: i32) -> (i32, i32) {
    %c0_i32 = arith.constant 0 : i32
    %c0_i32_0 = arith.constant 0 : i32
    %c0_i32_1 = arith.constant 0 : i32
    return %c0_i32, %c0_i32_0 : i32, i32
  }
  func.func @transform_13(%arg0: i32) -> (i32, i32) {
    %c0_i32 = arith.constant 0 : i32
    %c0_i32_0 = arith.constant 0 : i32
    %c0_i32_1 = arith.constant 0 : i32
    return %c0_i32, %c0_i32_0 : i32, i32
  }
  func.func @transform_14(%arg0: i32) -> (i32, i32) {
    %c0_i32 = arith.constant 0 : i32
    %c0_i32_0 = arith.constant 0 : i32
    return %arg0, %c0_i32 : i32, i32
  }
}

</mosaic_0001>

<bundles_post_ra>
// kernel: tpu_custom_call.1
= control target key start
LH: loop header
LB: loop body
LE: loop exit
PB: predicated region body
PF: predicated region fallthrough
CT: control target
= control target key end

     0   :  { %19 = vsyncpa [#allocation3], 0  ;;  %s3143_s0 = inlined_call_operand.hbm [shape: f32[16,32], index: 0, kind: input, shape index: {}]   ;;  %s3144_s1 = inlined_call_operand.vmem [shape: f32[32,32], index: 1, kind: input, shape index: {}]   ;;  %s3145_s2 = inlined_call_operand.vmem [shape: f32[32,32], index: 2, kind: input, shape index: {}]   ;;  %s3146_s3 = inlined_call_operand.vmem [shape: f32[32,32], index: 3, kind: input, shape index: {}]   ;;  %s3147_s4 = inlined_call_operand.vmem [shape: f32[32,32], index: 4, kind: input, shape index: {}]   ;;  %s3148_s5 = inlined_call_operand.vmem [shape: f32[1,32], index: 5, kind: input, shape index: {}]   ;;  %s3149_s6 = inlined_call_operand.vmem [shape: f32[1,32], index: 6, kind: input, shape index: {}]   ;;  %s3150_s7 = inlined_call_operand.vmem [shape: f32[1,32], index: 7, kind: input, shape index: {}]   ;;  %s3151_s8 = inlined_call_operand.vmem [shape: f32[1,32], index: 8, kind: input, shape index: {}]   ;;  %s3152_s9 = inlined_call_operand.vmem [shape: f32[1,32], index: 9, kind: input, shape index: {}]   ;;  %s3153_s10 = inlined_call_operand.vmem [shape: f32[32,128], index: 10, kind: input, shape index: {}]   ;;  %s3154_s11 = inlined_call_operand.vmem [shape: f32[1,128], index: 11, kind: input, shape index: {}]   ;;  %s3155_s12 = inlined_call_operand.vmem [shape: f32[128,32], index: 12, kind: input, shape index: {}]   ;;  %s3156_s13 = inlined_call_operand.vmem [shape: f32[1,32], index: 13, kind: input, shape index: {}]   ;;  %s3157_s14 = inlined_call_operand.hbm [shape: f32[16,32], index: 14, kind: output, shape index: {}]  }
   0x1   :  { %20 = vsyncpa [#allocation4], 0  ;;  %s2688_s29 = smov [#allocation2]  }
   0x2   :  { %s26_s30 = sshll.u32 %s2688_s29, 4  ;;  %s27_s30 = int_to_ptr.vmem [resolvable:$true] %s26_s30 }
   0x3   :  { %s2652_s15 = scalar_lea.vmem %s27_s30, 256  ;;  %p2657_p1 = scmp.lt.s32.totalorder %s27_s30, %s27_s30 }
   0x4   :  { %p2653_p0 = scmp.ne.s32.totalorder %s27_s30, %s2652_s15  ;;  %p2658_p2 = scmp.lt.s32.totalorder %s2652_s15, %s2652_s15 }
   0x6   :  { %p2659_p3 = por %p2658_p2, %p2657_p1 }
   0x8   :  { %p2660_p4 = pnand %p2659_p3, %p2653_p0 }
   0xa   :  { %2663 = shalt.err (!%p2660_p4)
}
   0xb   :  { %s2689_s16 = smov 128   ;;  %s2690_s17 = smov 8  }
   0xc   :  { %32 = dma.hbm_to_vmem [thread:$0]  %s3143_s0, 256, %s27_s30, [#allocation3], %s2689_s16, %s2689_s16, %s2690_s17  }
   0xd   :  { %2684 = dma.done.wait [#allocation3], 256  }
   0xe   :  { %2685 = vsyncadd [#allocation3], 4294967040  ;;  %vm64_vm0 = vcmask 261120   ;;  %v2778_v0 = vld [vmem:[#allocation2] sm:$0xff]  ;;  %v2780_v1 = vld [vmem:[#allocation2 + $0x8] sm:$0xff]  ;;  %v2691_v42 = vmov 0.0   ;;  %v355_v51 = vlaneseq }
   0xf   :  { %v65_v2 = vsel %vm64_vm0, %v2778_v0, 0.0  ;;  %v68_v3 = vsel %vm64_vm0, %v2780_v1, 0.0  ;;  %v113_v14 = vld [vmem:[%s3144_s1 + $0x18] sm:$0xff]  ;;  %v112_v15 = vld [vmem:[%s3144_s1 + $0x10] sm:$0xff]  ;;  %v111_v16 = vld [vmem:[%s3144_s1 + $0x8] sm:$0xff]  ;;  %2454 = vmatprep.subr.mxu1 %v2691_v42  ;;  %vm2692_vm1 = vmmov 0  }
  0x10   :  { %66 = vadd.xlane.f32.xlu0 %v65_v2  ;;  %2416 = vmatprep.subr.mxu0 %v113_v14  ;;  %v110_v17 = vld [vmem:[%s3144_s1] sm:$0xff]  ;;  %v200_v18 = vld [vmem:[%s3145_s2 + $0x18] sm:$0xff]  ;;  %v199_v35 = vld [vmem:[%s3145_s2 + $0x10] sm:$0xff]  ;;  %vm360_vm2 = vcmask 64512   ;;  %v356_v52 = vshrl.u32 %v355_v51, 7  ;;  %v358_v53 = vand.u32 127, %v355_v51 }
  0x11   :  { %2417 = vmatpush3.msra.mxu0 %v113_v14  ;;  %v2283_v26 = vld [vmem:[%s3149_s6] ss:$0 sm:$0xff]  ;;  %v198_v36 = vld [vmem:[%s3145_s2 + $0x8] sm:$0xff]  ;;  %v279_v38 = vld [vmem:[%s3146_s3 + $0x18] sm:$0xff]  ;;  %2456 = vmatprep.mubr.msk.f32.mxu1 %vm2692_vm1, %v2691_v42  ;;  %s2694_s28 = smov 112   ;;  %s2695_s18 = smov 104  }
  0x12   :  { %2418 = vmatprep.subr.mxu0 %v112_v15  ;;  %v2284_v28 = vld [vmem:[%s3150_s7] ss:$0 sm:$0xff]  ;;  %v278_v39 = vld [vmem:[%s3146_s3 + $0x10] sm:$0xff]  ;;  %v277_v40 = vld [vmem:[%s3146_s3 + $0x8] sm:$0xff]  ;;  %vm2874_vm3 = vcmp.ge.s32.totalorder %v356_v52, %v358_v53 }
  0x13   :  { %2419 = vmatpush3.msra.mxu0 %v112_v15  ;;  %v197_v37 = vld [vmem:[%s3145_s2] sm:$0xff] }
  0x14   :  { %69 = vadd.xlane.f32.xlu0 %v68_v3  ;;  %2420 = vmatprep.subr.mxu0 %v111_v16  ;;  %v276_v41 = vld [vmem:[%s3146_s3] sm:$0xff]  ;;  %s2693_s3 = smov 120  }
  0x15   :  { %2421 = vmatpush3.msra.mxu0 %v111_v16 }
  0x16   :  { %2422 = vmatprep.subr.mxu0 %v110_v17 }
  0x17   :  { %2423 = vmatpush3.msra.mxu0 %v110_v17 }
  0x18   :  { %2427 = vmatprep.subr.mxu0 %v200_v18 }
  0x99   :  { %v67_v4 = vpop.xlane.xlu0 %66 }
  0x9a   :  { %v72_v5 = vmul.f32 0.03125, %v67_v4 }
  0x9c   :  { %v74_v6 = vsub.f32 %v2778_v0, %v72_v5 }
  0x9d   :  { %v70_v7 = vpop.xlane.xlu0 %69 }
  0x9e   :  { %v73_v8 = vmul.f32 0.03125, %v70_v7  ;;  %v76_v9 = vmul.f32 %v74_v6, %v74_v6 }
  0xa0   :  { %v75_v10 = vsub.f32 %v2780_v1, %v73_v8  ;;  %v78_v11 = vsel %vm64_vm0, %v76_v9, 0.0 }
  0xa1   :  { %79 = vadd.xlane.f32.xlu1 %v78_v11 }
  0xa2   :  { %v77_v12 = vmul.f32 %v75_v10, %v75_v10 }
  0xa4   :  { %v81_v13 = vsel %vm64_vm0, %v77_v12, 0.0 }
  0xa5   :  { %82 = vadd.xlane.f32.xlu1 %v81_v13 }
 0x12a   :  { %v80_v19 = vpop.xlane.xlu1 %79 }
 0x12b   :  { %v84_v20 = vmul.f32 0.03125, %v80_v19 }
 0x12d   :  { %v86_v21 = vadd.f32 1e-05, %v84_v20 }
 0x12e   :  { %v83_v22 = vpop.xlane.xlu1 %82 }
 0x12f   :  { %2604 = vrsqrt.f32 %v86_v21  ;;  %v85_v23 = vmul.f32 0.03125, %v83_v22 }
 0x131   :  { %v87_v24 = vadd.f32 1e-05, %v85_v23 }
 0x133   :  { %2606 = vrsqrt.f32 %v87_v24 }
 0x13c   :  { %v2605_v25 = vpop.eup %2604 }
 0x13d   :  { %v90_v27 = vmul.f32 %v2605_v25, %v74_v6 }
 0x13f   :  { %v99_v29 = vmul.f32 %v2283_v26, %v90_v27 }
 0x140   :  { %v2607_v30 = vpop.eup %2606 }
 0x141   :  { %v91_v31 = vmul.f32 %v2607_v30, %v75_v10  ;;  %v108_v32 = vadd.f32 %v2284_v28, %v99_v29 }
 0x143   :  { %v100_v33 = vmul.f32 %v2283_v26, %v91_v31  ;;  %2424 = vmatprep.mubr.msk.f32.mxu0 %vm64_vm0, %v108_v32 }
 0x145   :  { %v109_v34 = vadd.f32 %v2284_v28, %v100_v33 }
 0x147   :  { %2425 = vmatmul.mubr.msk.f32.vlgmr.msra.gmra.mxu0 %vm64_vm0, %v109_v34 }
 0x148   :  { %2428 = vmatpush3.msra.mxu0 %v200_v18  ;;  %2435 = vmatprep.mubr.msk.f32.mxu0 %vm64_vm0, %v108_v32 }
 0x149   :  { %2429 = vmatprep.subr.mxu0 %v199_v35 }
 0x14a   :  { %2430 = vmatpush3.msra.mxu0 %v199_v35 }
 0x14b   :  { %2431 = vmatprep.subr.mxu0 %v198_v36 }
 0x14c   :  { %2432 = vmatpush3.msra.mxu0 %v198_v36 }
 0x14d   :  { %2433 = vmatprep.subr.mxu0 %v197_v37 }
 0x14e   :  { %2434 = vmatpush3.msra.mxu0 %v197_v37 }
 0x14f   :  { %2436 = vmatmul.mubr.msk.f32.vlgmr.msra.gmra.mxu0 %vm64_vm0, %v109_v34  ;;  %2438 = vmatprep.subr.mxu0 %v279_v38 }
 0x150   :  { %2439 = vmatpush3.msra.mxu0 %v279_v38  ;;  %2446 = vmatprep.mubr.msk.f32.mxu0 %vm64_vm0, %v108_v32  ;;  %v685_v32 = vld [vmem:[%s3147_s4] sm:$0xff] }
 0x151   :  { %2440 = vmatprep.subr.mxu0 %v278_v39 }
 0x152   :  { %2441 = vmatpush3.msra.mxu0 %v278_v39 }
 0x153   :  { %2442 = vmatprep.subr.mxu0 %v277_v40 }
 0x154   :  { %2443 = vmatpush3.msra.mxu0 %v277_v40 }
 0x155   :  { %2444 = vmatprep.subr.mxu0 %v276_v41 }
 0x156   :  { %2445 = vmatpush3.msra.mxu0 %v276_v41 }
 0x157   :  { %2447 = vmatmul.mubr.msk.f32.vlgmr.msra.gmra.mxu0 %vm64_vm0, %v109_v34  ;;  %2449 = vmatprep.subr.mxu0 %v2691_v42 }
 0x158   :  { %2451 = vmatprep.mubr.msk.f32.mxu0 %vm2692_vm1, %v2691_v42 }
 0x207   :  { %v2426_v43 = vpop.f32.mrf.mxu0 }
 0x208   :  { %v2848_v46 = vmul.f32 0.35355338, %v2426_v43 }
 0x209   :  { %v186_v44 = vpop.f32.mrf.mxu0 }
 0x20a   :  { %v2855_v48 = vmul.f32 0.35355338, %v186_v44 }
 0x20f   :  { %v2844_v45 = vpop.f32.mrf.mxu0 }
 0x210   :  { %2455 = vmatpush3.xpose.msk.msra.mxu1 %vm360_vm2, %v2844_v45 }
 0x211   :  { %v2850_v47 = vpop.f32.mrf.mxu0  ;;  %2464 = vmatprep.subr.mxu1 %v2691_v42 }
 0x212   :  { %2450 = vmatpush3.xpose.msk.msra.mxu0 %vm360_vm2, %v2850_v47 }
 0x213   :  { %2457 = vmatmul.mubr.msk.f32.vlgmr.msra.gmra.mxu1 %vm360_vm2, %v2848_v46  ;;  %2459 = vmatprep.subr.mxu0 %v2691_v42 }
 0x214   :  { %2466 = vmatprep.mubr.msk.f32.mxu1 %vm2692_vm1, %v2691_v42 }
 0x215   :  { %2452 = vmatmul.mubr.msk.f32.vlgmr.msra.gmra.mxu0 %vm360_vm2, %v2855_v48 }
 0x216   :  { %2461 = vmatprep.mubr.msk.f32.mxu0 %vm2692_vm1, %v2691_v42 }
 0x217   :  { %v2866_v49 = vpop.f32.mrf.mxu0 }
 0x218   :  { %2465 = vmatpush3.msra.mxu1 %v2866_v49 }
 0x219   :  { %v2869_v50 = vpop.f32.mrf.mxu0  ;;  %2474 = vmatprep.subr.mxu1 %v2691_v42 }
 0x21a   :  { %2460 = vmatpush3.msra.mxu0 %v2869_v50 }
 0x21b   :  { %2469 = vmatprep.subr.mxu0 %v2691_v42 }
 0x2d3   :  { %v509_v55 = vpop.f32.mrf.mxu1 }
 0x2d4   :  { %v516_v56 = vsel %vm2874_vm3, %v509_v55, -inf }
 0x2d5   :  { %v433_v57 = vpop.f32.mrf.mxu0  ;;  %v2458_v58 = vpop.f32.mrf.mxu1  ;;  %v520_v59 = vsel %vm360_vm2, %v516_v56, -inf }
 0x2d6   :  { %v515_v60 = vsel %vm2874_vm3, %v433_v57, -inf  ;;  %521 = vmax.xlane.f32.xlu1 %v520_v59  ;;  %v1020_v57 = vld [vmem:[%s3147_s4 + $0x8] sm:$0xff] }
 0x2d7   :  { %v2453_v61 = vpop.f32.mrf.mxu0  ;;  %v517_v62 = vsel %vm360_vm2, %v515_v60, -inf }
 0x2d8   :  { %518 = vmax.xlane.f32.xlu0 %v517_v62 }
 0x2e7   :  { %766 = vrot.lane.b32.xlu1 %v2844_v45, %s2693_s3 }
 0x2eb   :  { %686 = vrot.lane.b32.xlu1 %v2855_v48, %s2693_s3 }
 0x2ee   :  { %688 = vrot.lane.b32.xlu0 %v2850_v47, %s2693_s3 }
 0x2ef   :  { %764 = vrot.lane.b32.xlu1 %v2848_v46, %s2693_s3 }
 0x35f   :  { %v522_v63 = vpop.xlane.xlu1 %521 }
 0x360   :  { %v524_v2 = vsub.f32 %v516_v56, %v522_v63 }
 0x361   :  { %v519_v3 = vpop.xlane.xlu0 %518 }
 0x362   :  { %v527_v4 = vmul.f32 1.442695, %v524_v2  ;;  %v523_v5 = vsub.f32 %v515_v60, %v519_v3 }
 0x363   :  { %v767_v7 = vpop.permute.xlu1 %766 }
 0x364   :  { %2608 = vpow2.f32 %v527_v4  ;;  %v525_v6 = vmul.f32 1.442695, %v523_v5 }
 0x365   :  { %v689_v11 = vpop.permute.xlu0 %688 }
 0x366   :  { %2610 = vpow2.f32 %v525_v6 }
 0x367   :  { %v687_v8 = vpop.permute.xlu1 %686 }
 0x36b   :  { %v765_v12 = vpop.permute.xlu1 %764 }
 0x371   :  { %v2609_v9 = vpop.eup %2608 }
 0x372   :  { %2467 = vmatmul.mubr.msk.f32.vlgmr.msra.gmra.mxu1 %vm360_vm2, %v2609_v9  ;;  %v532_v26 = vsel %vm360_vm2, %v2609_v9, 0.0 }
 0x373   :  { %v2611_v10 = vpop.eup %2610  ;;  %2475 = vmatpush3.xpose.msk.msra.mxu1 %vm360_vm2, %v767_v7  ;;  %2476 = vmatprep.mubr.msk.f32.mxu1 %vm2692_vm1, %v2691_v42 }
 0x374   :  { %2462 = vmatmul.mubr.msk.f32.vlgmr.msra.gmra.mxu0 %vm360_vm2, %v2611_v10  ;;  %2484 = vmatprep.subr.mxu1 %v2691_v42  ;;  %v529_v25 = vsel %vm360_vm2, %v2611_v10, 0.0 }
 0x375   :  { %2470 = vmatpush3.xpose.msk.msra.mxu0 %vm360_vm2, %v689_v11  ;;  %2471 = vmatprep.mubr.msk.f32.mxu0 %vm2692_vm1, %v2691_v42 }
 0x376   :  { %2477 = vmatmul.mubr.msk.f32.vlgmr.msra.gmra.mxu1 %vm360_vm2, %v765_v12  ;;  %2479 = vmatprep.subr.mxu0 %v2691_v42 }
 0x377   :  { %2486 = vmatprep.mubr.msk.f32.mxu1 %vm2692_vm1, %v2691_v42 }
 0x378   :  { %2472 = vmatmul.mubr.msk.f32.vlgmr.msra.gmra.mxu0 %vm360_vm2, %v687_v8 }
 0x379   :  { %2481 = vmatprep.mubr.msk.f32.mxu0 %vm2692_vm1, %v2691_v42 }
 0x432   :  { %v677_v13 = vpop.f32.mrf.mxu1 }
 0x434   :  { %v604_v14 = vpop.f32.mrf.mxu0  ;;  %v2468_v15 = vpop.f32.mrf.mxu1 }
 0x436   :  { %v2463_v16 = vpop.f32.mrf.mxu0  ;;  %v838_v17 = vpop.f32.mrf.mxu1 }
 0x437   :  { %v843_v18 = vsel %vm2874_vm3, %v838_v17, -inf }
 0x438   :  { %v760_v19 = vpop.f32.mrf.mxu0  ;;  %v2478_v20 = vpop.f32.mrf.mxu1  ;;  %v847_v21 = vsel %vm360_vm2, %v843_v18, -inf }
 0x439   :  { %v842_v22 = vsel %vm2874_vm3, %v760_v19, -inf  ;;  %848 = vmax.xlane.f32.xlu1 %v847_v21 }
 0x43a   :  { %v2473_v23 = vpop.f32.mrf.mxu0  ;;  %v844_v24 = vsel %vm360_vm2, %v842_v22, -inf }
 0x43b   :  { %845 = vmax.xlane.f32.xlu0 %v844_v24 }
 0x44a   :  { %940 = vrot.lane.b32.xlu1 %v2866_v49, %s2693_s3 }
 0x451   :  { %863 = vrot.lane.b32.xlu0 %v2869_v50, %s2693_s3 }
 0x46e   :  { %530 = vadd.xlane.f32.xlu1 %v529_v25 }
 0x470   :  { %533 = vadd.xlane.f32.xlu0 %v532_v26 }
 0x47f   :  { %1263 = vrot.lane.b32.xlu1 %v2844_v45, %s2694_s28 }
 0x483   :  { %1183 = vrot.lane.b32.xlu1 %v2855_v48, %s2694_s28 }
 0x487   :  { %1261 = vrot.lane.b32.xlu1 %v2848_v46, %s2694_s28 }
 0x4c2   :  { %v849_v27 = vpop.xlane.xlu1 %848 }
 0x4c3   :  { %v851_v28 = vsub.f32 %v843_v18, %v849_v27 }
 0x4c4   :  { %v846_v29 = vpop.xlane.xlu0 %845 }
 0x4c5   :  { %v854_v30 = vmul.f32 1.442695, %v851_v28  ;;  %v850_v31 = vsub.f32 %v842_v22, %v846_v29 }
 0x4c6   :  { %v941_v33 = vpop.permute.xlu1 %940 }
 0x4c7   :  { %2612 = vpow2.f32 %v854_v30  ;;  %v852_v34 = vmul.f32 1.442695, %v850_v31  ;;  %2485 = vmatpush3.msra.mxu1 %v941_v33  ;;  %v1515_v31 = vld [vmem:[%s3147_s4 + $0x10] sm:$0xff] }
 0x4c8   :  { %v864_v35 = vpop.permute.xlu0 %863  ;;  %2494 = vmatprep.subr.mxu1 %v685_v32 }
 0x4c9   :  { %2614 = vpow2.f32 %v852_v34  ;;  %2480 = vmatpush3.msra.mxu0 %v864_v35 }
 0x4ca   :  { %2489 = vmatprep.subr.mxu0 %v1020_v57 }
 0x4d4   :  { %v2613_v36 = vpop.eup %2612 }
 0x4d5   :  { %2487 = vmatmul.mubr.msk.f32.vlgmr.msra.gmra.mxu1 %vm360_vm2, %v2613_v36  ;;  %v859_v37 = vsel %vm360_vm2, %v2613_v36, 0.0 }
 0x4d6   :  { %v2615_v38 = vpop.eup %2614  ;;  %860 = vadd.xlane.f32.xlu0 %v859_v37  ;;  %2495 = vmatpush3.msra.mxu1 %v685_v32 }
 0x4d7   :  { %2482 = vmatmul.mubr.msk.f32.vlgmr.msra.gmra.mxu0 %vm360_vm2, %v2615_v38  ;;  %2504 = vmatprep.subr.mxu1 %v2691_v42  ;;  %v856_v39 = vsel %vm360_vm2, %v2615_v38, 0.0 }
 0x4d8   :  { %2490 = vmatpush3.msra.mxu0 %v1020_v57 }
 0x4d9   :  { %2499 = vmatprep.subr.mxu0 %v2691_v42 }
 0x4da   :  { %857 = vadd.xlane.f32.xlu0 %v856_v39 }
 0x4f0   :  { %1185 = vrot.lane.b32.xlu0 %v2850_v47, %s2694_s28 }
 0x4f7   :  { %v531_v40 = vpop.xlane.xlu1 %530 }
 0x4f8   :  { %2616 = vrcp.f32 %v531_v40 }
 0x4f9   :  { %v534_v41 = vpop.xlane.xlu0 %533 }
 0x4fa   :  { %2618 = vrcp.f32 %v534_v41 }
 0x4fb   :  { %v1264_v43 = vpop.permute.xlu1 %1263 }
 0x4ff   :  { %v1184_v53 = vpop.permute.xlu1 %1183 }
 0x503   :  { %v1262_v56 = vpop.permute.xlu1 %1261 }
 0x505   :  { %v2617_v44 = vpop.eup %2616 }
 0x506   :  { %v683_v51 = vmul.f32 %v2617_v44, %v604_v14 }
 0x507   :  { %v2619_v52 = vpop.eup %2618 }
 0x508   :  { %2496 = vmatprep.mubr.msk.f32.mxu1 %vm360_vm2, %v683_v51  ;;  %v684_v55 = vmul.f32 %v2619_v52, %v677_v13 }
 0x50a   :  { %2497 = vmatmul.mubr.msk.f32.vlgmr.msra.gmra.mxu1 %vm360_vm2, %v684_v55 }
 0x50b   :  { %2505 = vmatpush3.xpose.msk.msra.mxu1 %vm360_vm2, %v1264_v43  ;;  %2506 = vmatprep.mubr.msk.f32.mxu1 %vm2692_vm1, %v2691_v42 }
 0x50c   :  { %2514 = vmatprep.subr.mxu1 %v2691_v42 }
 0x50e   :  { %2507 = vmatmul.mubr.msk.f32.vlgmr.msra.gmra.mxu1 %vm360_vm2, %v1262_v56 }
 0x50f   :  { %2516 = vmatprep.mubr.msk.f32.mxu1 %vm2692_vm1, %v2691_v42 }
 0x55f   :  { %v861_v58 = vpop.xlane.xlu0 %860 }
 0x563   :  { %v858_v59 = vpop.xlane.xlu0 %857 }
 0x564   :  { %2620 = vrcp.f32 %v858_v59 }
 0x565   :  { %2622 = vrcp.f32 %v861_v58 }
 0x567   :  { %v1186_v6 = vpop.permute.xlu0 %1185 }
 0x571   :  { %v2621_v61 = vpop.eup %2620 }
 0x572   :  { %v2623_v2 = vpop.eup %2622 }
 0x595   :  { %v1012_v60 = vpop.f32.mrf.mxu1 }
 0x596   :  { %v1019_v4 = vmul.f32 %v2623_v2, %v1012_v60 }
 0x597   :  { %v935_v62 = vpop.f32.mrf.mxu0  ;;  %v2488_v63 = vpop.f32.mrf.mxu1 }
 0x598   :  { %v1018_v3 = vmul.f32 %v2621_v61, %v935_v62 }
 0x599   :  { %v2483_v5 = vpop.f32.mrf.mxu0 }
 0x59a   :  { %2491 = vmatprep.mubr.msk.f32.mxu0 %vm360_vm2, %v1018_v3 }
 0x59b   :  { %2492 = vmatmul.mubr.msk.f32.vlgmr.msra.gmra.mxu0 %vm360_vm2, %v1019_v4 }
 0x59c   :  { %2500 = vmatpush3.xpose.msk.msra.mxu0 %vm360_vm2, %v1186_v6  ;;  %2501 = vmatprep.mubr.msk.f32.mxu0 %vm2692_vm1, %v2691_v42 }
 0x59d   :  { %2509 = vmatprep.subr.mxu0 %v2691_v42 }
 0x59f   :  { %2502 = vmatmul.mubr.msk.f32.vlgmr.msra.gmra.mxu0 %vm360_vm2, %v1184_v53 }
 0x5a0   :  { %2511 = vmatprep.mubr.msk.f32.mxu0 %vm2692_vm1, %v2691_v42 }
 0x5ca   :  { %v2958_v7 = vpop.f32.mrf.mxu1 }
 0x5cc   :  { %v2960_v8 = vpop.f32.mrf.mxu1 }
 0x5ce   :  { %v1335_v9 = vpop.f32.mrf.mxu1 }
 0x5cf   :  { %v1340_v10 = vsel %vm2874_vm3, %v1335_v9, -inf }
 0x5d0   :  { %v2508_v11 = vpop.f32.mrf.mxu1  ;;  %v1344_v12 = vsel %vm360_vm2, %v1340_v10, -inf }
 0x5d1   :  { %1345 = vmax.xlane.f32.xlu1 %v1344_v12 }
 0x5e2   :  { %1435 = vrot.lane.b32.xlu1 %v2866_v49, %s2694_s28 }
 0x65a   :  { %v1346_v13 = vpop.xlane.xlu1 %1345 }
 0x65b   :  { %v1348_v14 = vsub.f32 %v1340_v10, %v1346_v13  ;;  %v2967_v15 = vpop.f32.mrf.mxu0  ;;  %v1931_v10 = vld [vmem:[%s3147_s4 + $0x18] sm:$0xff] }
 0x65c   :  { %v1180_v53 = vadd.f32 %v2958_v7, %v2967_v15 }
 0x65d   :  { %v1351_v16 = vmul.f32 1.442695, %v1348_v14  ;;  %v2969_v17 = vpop.f32.mrf.mxu0 }
 0x65e   :  { %v1436_v18 = vpop.permute.xlu1 %1435  ;;  %v1175_v56 = vadd.f32 %v2960_v8, %v2969_v17 }
 0x65f   :  { %2624 = vpow2.f32 %v1351_v16  ;;  %v1257_v19 = vpop.f32.mrf.mxu0  ;;  %2515 = vmatpush3.msra.mxu1 %v1436_v18 }
 0x660   :  { %v1339_v20 = vsel %vm2874_vm3, %v1257_v19, -inf  ;;  %2524 = vmatprep.subr.mxu1 %v2691_v42 }
 0x661   :  { %v2503_v21 = vpop.f32.mrf.mxu0  ;;  %v1341_v22 = vsel %vm360_vm2, %v1339_v20, -inf }
 0x662   :  { %1342 = vmax.xlane.f32.xlu0 %v1341_v22 }
 0x66c   :  { %v2625_v23 = vpop.eup %2624 }
 0x66d   :  { %2517 = vmatmul.mubr.msk.f32.vlgmr.msra.gmra.mxu1 %vm360_vm2, %v2625_v23  ;;  %v1356_v24 = vsel %vm360_vm2, %v2625_v23, 0.0 }
 0x66e   :  { %1357 = vadd.xlane.f32.xlu1 %v1356_v24  ;;  %2526 = vmatprep.mubr.msk.f32.mxu1 %vm2692_vm1, %v2691_v42 }
 0x678   :  { %1359 = vrot.lane.b32.xlu0 %v2869_v50, %s2694_s28 }
 0x67f   :  { %1679 = vrot.lane.b32.xlu1 %v2844_v45, %s2695_s18 }
 0x683   :  { %1677 = vrot.lane.b32.xlu1 %v2848_v46, %s2695_s18 }
 0x6eb   :  { %v1343_v25 = vpop.xlane.xlu0 %1342 }
 0x6ec   :  { %v1347_v26 = vsub.f32 %v1339_v20, %v1343_v25 }
 0x6ee   :  { %v1349_v27 = vmul.f32 1.442695, %v1347_v26 }
 0x6ef   :  { %v1360_v28 = vpop.permute.xlu0 %1359 }
 0x6f0   :  { %2626 = vpow2.f32 %v1349_v27  ;;  %2510 = vmatpush3.msra.mxu0 %v1360_v28  ;;  %v2323_v27 = vld [vmem:[%s3148_s5] ss:$0 sm:$0xff] }
 0x6f1   :  { %2519 = vmatprep.subr.mxu0 %v1515_v31 }
 0x6fd   :  { %v2627_v29 = vpop.eup %2626 }
 0x6fe   :  { %2512 = vmatmul.mubr.msk.f32.vlgmr.msra.gmra.mxu0 %vm360_vm2, %v2627_v29  ;;  %v1353_v30 = vsel %vm360_vm2, %v2627_v29, 0.0 }
 0x6ff   :  { %1354 = vadd.xlane.f32.xlu0 %v1353_v30  ;;  %2520 = vmatpush3.msra.mxu0 %v1515_v31 }
 0x700   :  { %2529 = vmatprep.subr.mxu0 %v2691_v42 }
 0x715   :  { %1601 = vrot.lane.b32.xlu0 %v2850_v47, %s2695_s18 }
 0x719   :  { %1599 = vrot.lane.b32.xlu0 %v2855_v48, %s2695_s18  ;;  %v1358_v48 = vpop.xlane.xlu1 %1357 }
 0x71d   :  { %v1680_v37 = vpop.permute.xlu1 %1679 }
 0x721   :  { %v1678_v41 = vpop.permute.xlu1 %1677 }
 0x72d   :  { %v1507_v45 = vpop.f32.mrf.mxu1 }
 0x72f   :  { %v2518_v46 = vpop.f32.mrf.mxu1 }
 0x788   :  { %v1355_v32 = vpop.xlane.xlu0 %1354 }
 0x789   :  { %2628 = vrcp.f32 %v1355_v32 }
 0x78a   :  { %2630 = vrcp.f32 %v1358_v48 }
 0x78c   :  { %v1602_v33 = vpop.permute.xlu0 %1601 }
 0x78d   :  { %2525 = vmatpush3.xpose.msk.msra.mxu1 %vm360_vm2, %v1602_v33 }
 0x78e   :  { %2534 = vmatprep.subr.mxu1 %v2691_v42 }
 0x790   :  { %v1600_v47 = vpop.permute.xlu0 %1599 }
 0x791   :  { %2527 = vmatmul.mubr.msk.f32.vlgmr.msra.gmra.mxu1 %vm360_vm2, %v1600_v47 }
 0x792   :  { %2536 = vmatprep.mubr.msk.f32.mxu1 %vm2692_vm1, %v2691_v42 }
 0x796   :  { %v2629_v34 = vpop.eup %2628 }
 0x797   :  { %v2631_v36 = vpop.eup %2630 }
 0x798   :  { %v1514_v39 = vmul.f32 %v2631_v36, %v1507_v45  ;;  %v2073_v36 = vld [vmem:[%s3153_s10 + $0x18] sm:$0xff] }
 0x7be   :  { %v1431_v35 = vpop.f32.mrf.mxu0 }
 0x7bf   :  { %v1513_v38 = vmul.f32 %v2629_v34, %v1431_v35 }
 0x7c0   :  { %v2513_v40 = vpop.f32.mrf.mxu0 }
 0x7c1   :  { %2521 = vmatprep.mubr.msk.f32.mxu0 %vm360_vm2, %v1513_v38  ;;  %v2071_v38 = vld [vmem:[%s3153_s10 + $0x8] sm:$0xff]  ;;  %v2179_v40 = vld [vmem:[%s3155_s12 + $0x78] sm:$0xff] }
 0x7c2   :  { %2522 = vmatmul.mubr.msk.f32.vlgmr.msra.gmra.mxu0 %vm360_vm2, %v1514_v39  ;;  %v2070_v39 = vld [vmem:[%s3153_s10] sm:$0xff] }
 0x7c3   :  { %2530 = vmatpush3.xpose.msk.msra.mxu0 %vm360_vm2, %v1680_v37  ;;  %2531 = vmatprep.mubr.msk.f32.mxu0 %vm2692_vm1, %v2691_v42  ;;  %v2072_v37 = vld [vmem:[%s3153_s10 + $0x10] sm:$0xff] }
 0x7c4   :  { %2539 = vmatprep.subr.mxu0 %v2691_v42 }
 0x7c6   :  { %2532 = vmatmul.mubr.msk.f32.vlgmr.msra.gmra.mxu0 %vm360_vm2, %v1678_v41  ;;  %v2178_v41 = vld [vmem:[%s3155_s12 + $0x70] sm:$0xff] }
 0x7c7   :  { %2541 = vmatprep.mubr.msk.f32.mxu0 %vm2692_vm1, %v2691_v42 }
 0x851   :  { %v1673_v43 = vpop.f32.mrf.mxu1 }
 0x852   :  { %v1755_v44 = vsel %vm2874_vm3, %v1673_v43, -inf  ;;  %v2177_v43 = vld [vmem:[%s3155_s12 + $0x68] sm:$0xff] }
 0x853   :  { %v2528_v51 = vpop.f32.mrf.mxu1  ;;  %v1757_v52 = vsel %vm360_vm2, %v1755_v44, -inf }
 0x854   :  { %1758 = vmax.xlane.f32.xlu0 %v1757_v52  ;;  %v2175_v51 = vld [vmem:[%s3155_s12 + $0x58] sm:$0xff]  ;;  %v2174_v52 = vld [vmem:[%s3155_s12 + $0x50] sm:$0xff] }
 0x86a   :  { %1775 = vrot.lane.b32.xlu0 %v2869_v50, %s2695_s18 }
 0x882   :  { %v2523_v55 = vpop.f32.mrf.mxu0 }
 0x883   :  { %v1598_v57 = vadd.f32 %v2523_v55, %v1180_v53  ;;  %v2173_v53 = vld [vmem:[%s3155_s12 + $0x48] sm:$0xff]  ;;  %v2172_v55 = vld [vmem:[%s3155_s12 + $0x40] sm:$0xff] }
 0x884   :  { %v1588_v42 = vpop.f32.mrf.mxu0 }
 0x885   :  { %v1597_v58 = vadd.f32 %v1588_v42, %v1175_v56  ;;  %v2171_v56 = vld [vmem:[%s3155_s12 + $0x38] sm:$0xff]  ;;  %v2169_v42 = vld [vmem:[%s3155_s12 + $0x28] sm:$0xff] }
 0x886   :  { %v1751_v59 = vpop.f32.mrf.mxu0 }
 0x887   :  { %v1756_v60 = vsel %vm2874_vm3, %v1751_v59, -inf }
 0x888   :  { %v2533_v61 = vpop.f32.mrf.mxu0  ;;  %v1760_v62 = vsel %vm360_vm2, %v1756_v60, -inf }
 0x889   :  { %1761 = vmax.xlane.f32.xlu1 %v1760_v62 }
 0x89a   :  { %1851 = vrot.lane.b32.xlu1 %v2866_v49, %s2695_s18 }
 0x8dd   :  { %v1759_v50 = vpop.xlane.xlu0 %1758 }
 0x8de   :  { %v1763_v63 = vsub.f32 %v1755_v44, %v1759_v50  ;;  %v2176_v44 = vld [vmem:[%s3155_s12 + $0x60] sm:$0xff] }
 0x8e0   :  { %v1765_v2 = vmul.f32 1.442695, %v1763_v63 }
 0x8e1   :  { %v1776_v3 = vpop.permute.xlu0 %1775 }
 0x8e2   :  { %2632 = vpow2.f32 %v1765_v2  ;;  %2535 = vmatpush3.msra.mxu1 %v1776_v3  ;;  %v2324_v3 = vld [vmem:[%s3151_s8] ss:$0 sm:$0xff] }
 0x8e3   :  { %2544 = vmatprep.subr.mxu1 %v1931_v10 }
 0x8ef   :  { %v2633_v4 = vpop.eup %2632 }
 0x8f0   :  { %2537 = vmatmul.mubr.msk.f32.vlgmr.msra.gmra.mxu1 %vm360_vm2, %v2633_v4  ;;  %v1769_v5 = vsel %vm360_vm2, %v2633_v4, 0.0 }
 0x8f1   :  { %1770 = vadd.xlane.f32.xlu0 %v1769_v5  ;;  %2545 = vmatpush3.msra.mxu1 %v1931_v10  ;;  %v2325_v5 = vld [vmem:[%s3152_s9] ss:$0 sm:$0xff]  ;;  %v2167_v10 = vld [vmem:[%s3155_s12 + $0x18] sm:$0xff] }
 0x8f2   :  { %2560 = vmatprep.subr.mxu1 %v2179_v40 }
 0x912   :  { %v1762_v54 = vpop.xlane.xlu1 %1761 }
 0x913   :  { %v1764_v6 = vsub.f32 %v1756_v60, %v1762_v54 }
 0x915   :  { %v1767_v7 = vmul.f32 1.442695, %v1764_v6 }
 0x916   :  { %v1852_v8 = vpop.permute.xlu1 %1851 }
 0x917   :  { %2634 = vpow2.f32 %v1767_v7  ;;  %2540 = vmatpush3.msra.mxu0 %v1852_v8 }
 0x918   :  { %2549 = vmatprep.subr.mxu0 %v2073_v36 }
 0x924   :  { %v2635_v9 = vpop.eup %2634 }
 0x925   :  { %2542 = vmatmul.mubr.msk.f32.vlgmr.msra.gmra.mxu0 %vm360_vm2, %v2635_v9  ;;  %v1772_v49 = vsel %vm360_vm2, %v2635_v9, 0.0 }
 0x926   :  { %1773 = vadd.xlane.f32.xlu1 %v1772_v49  ;;  %2550 = vmatpush3.msra.mxu0 %v2073_v36 }
 0x927   :  { %2551 = vmatprep.subr.mxu0 %v2072_v37 }
 0x928   :  { %2552 = vmatpush3.msra.mxu0 %v2072_v37 }
 0x929   :  { %2553 = vmatprep.subr.mxu0 %v2071_v38 }
 0x92a   :  { %2554 = vmatpush3.msra.mxu0 %v2071_v38 }
 0x92b   :  { %2555 = vmatprep.subr.mxu0 %v2070_v39 }
 0x92c   :  { %2556 = vmatpush3.msra.mxu0 %v2070_v39 }
 0x97a   :  { %v1771_v11 = vpop.xlane.xlu0 %1770 }
 0x97b   :  { %2636 = vrcp.f32 %v1771_v11  ;;  %v2166_v11 = vld [vmem:[%s3155_s12 + $0x10] sm:$0xff] }
 0x988   :  { %v2637_v12 = vpop.eup %2636 }
 0x9af   :  { %v1774_v16 = vpop.xlane.xlu1 %1773 }
 0x9b0   :  { %v1847_v13 = vpop.f32.mrf.mxu1  ;;  %2638 = vrcp.f32 %v1774_v16 }
 0x9b1   :  { %v1929_v14 = vmul.f32 %v2637_v12, %v1847_v13  ;;  %v2165_v12 = vld [vmem:[%s3155_s12 + $0x8] sm:$0xff]  ;;  %v2164_v13 = vld [vmem:[%s3155_s12] sm:$0xff] }
 0x9b2   :  { %v2538_v15 = vpop.f32.mrf.mxu1 }
 0x9b3   :  { %2546 = vmatprep.mubr.msk.f32.mxu1 %vm360_vm2, %v1929_v14  ;;  %v2326_v14 = vld [vmem:[%s3154_s11] ss:$0 sm:$0xff] }
 0x9bd   :  { %v2639_v17 = vpop.eup %2638 }
 0x9e5   :  { %v1923_v18 = vpop.f32.mrf.mxu0 }
 0x9e6   :  { %v1930_v19 = vmul.f32 %v2639_v17, %v1923_v18 }
 0x9e7   :  { %v2543_v20 = vpop.f32.mrf.mxu0 }
 0x9e8   :  { %2547 = vmatmul.mubr.msk.f32.vlgmr.msra.gmra.mxu1 %vm360_vm2, %v1930_v19 }
 0x9e9   :  { %2561 = vmatpush3.msra.mxu1 %v2179_v40 }
 0x9ea   :  { %2562 = vmatprep.subr.mxu1 %v2178_v41 }
 0x9eb   :  { %2563 = vmatpush3.msra.mxu1 %v2178_v41 }
 0x9ec   :  { %2564 = vmatprep.subr.mxu1 %v2177_v43 }
 0x9ed   :  { %2565 = vmatpush3.msra.mxu1 %v2177_v43 }
 0x9ee   :  { %2566 = vmatprep.subr.mxu1 %v2176_v44 }
 0x9ef   :  { %2567 = vmatpush3.msra.mxu1 %v2176_v44 }
 0x9f0   :  { %2568 = vmatprep.subr.mxu1 %v2175_v51 }
 0x9f1   :  { %2569 = vmatpush3.msra.mxu1 %v2175_v51 }
 0x9f2   :  { %2570 = vmatprep.subr.mxu1 %v2174_v52 }
 0x9f3   :  { %2571 = vmatpush3.msra.mxu1 %v2174_v52 }
 0x9f4   :  { %2572 = vmatprep.subr.mxu1 %v2173_v53 }
 0x9f5   :  { %2573 = vmatpush3.msra.mxu1 %v2173_v53 }
 0x9f6   :  { %2574 = vmatprep.subr.mxu1 %v2172_v55 }
 0x9f7   :  { %2575 = vmatpush3.msra.mxu1 %v2172_v55 }
 0x9f8   :  { %2576 = vmatprep.subr.mxu1 %v2171_v56 }
 0x9f9   :  { %2577 = vmatpush3.msra.mxu1 %v2171_v56 }
 0xaa8   :  { %v2548_v21 = vpop.f32.mrf.mxu1 }
 0xaa9   :  { %v2014_v22 = vadd.f32 %v2548_v21, %v1598_v57  ;;  %v2170_v57 = vld [vmem:[%s3155_s12 + $0x30] sm:$0xff]  ;;  %v2329_v21 = vld [vmem:[%s3156_s13] ss:$0 sm:$0xff] }
 0xaaa   :  { %v2004_v23 = vpop.f32.mrf.mxu1  ;;  %2578 = vmatprep.subr.mxu1 %v2170_v57 }
 0xaab   :  { %v2013_v24 = vadd.f32 %v2004_v23, %v1597_v58  ;;  %v2016_v25 = vadd.f32 %v2014_v22, %v2780_v1  ;;  %2579 = vmatpush3.msra.mxu1 %v2170_v57  ;;  %v2168_v58 = vld [vmem:[%s3155_s12 + $0x20] sm:$0xff]  ;;  %s2696_s12 = smov [#allocation5]  }
 0xaac   :  { %2580 = vmatprep.subr.mxu1 %v2169_v42  ;;  %s2271_s5 = sshll.u32 %s2696_s12, 4  ;;  %s2272_s5 = int_to_ptr.vmem [resolvable:$true] %s2271_s5 }
 0xaad   :  { %v2015_v26 = vadd.f32 %v2013_v24, %v2778_v0  ;;  %v3039_v29 = vadd.f32 %v2323_v27, %v2016_v25  ;;  %2581 = vmatpush3.msra.mxu1 %v2169_v42  ;;  %s2664_s11 = scalar_lea.vmem %s2272_s5, 256  ;;  %p2669_p6 = scmp.lt.s32.totalorder %s2272_s5, %s2272_s5 }
 0xaae   :  { %2582 = vmatprep.subr.mxu1 %v2168_v58  ;;  %p2665_p5 = scmp.ne.s32.totalorder %s2272_s5, %s2664_s11  ;;  %p2670_p7 = scmp.lt.s32.totalorder %s2664_s11, %s2664_s11 }
 0xaaf   :  { %v3037_v28 = vadd.f32 %v2323_v27, %v2015_v26  ;;  %v2029_v45 = vsel %vm64_vm0, %v3039_v29, 0.0  ;;  %2583 = vmatpush3.msra.mxu1 %v2168_v58 }
 0xab0   :  { %2584 = vmatprep.subr.mxu1 %v2167_v10  ;;  %p2671_p8 = por %p2670_p7, %p2669_p6 }
 0xab1   :  { %v2026_v30 = vsel %vm64_vm0, %v3037_v28, 0.0  ;;  %2585 = vmatpush3.msra.mxu1 %v2167_v10 }
 0xab2   :  { %2027 = vadd.xlane.f32.xlu0 %v2026_v30  ;;  %2586 = vmatprep.subr.mxu1 %v2166_v11  ;;  %p2672_p9 = pnand %p2671_p8, %p2665_p5 }
 0xab3   :  { %2587 = vmatpush3.msra.mxu1 %v2166_v11 }
 0xab4   :  { %2588 = vmatprep.subr.mxu1 %v2165_v12 }
 0xab5   :  { %2589 = vmatpush3.msra.mxu1 %v2165_v12 }
 0xab6   :  { %2030 = vadd.xlane.f32.xlu0 %v2029_v45  ;;  %2590 = vmatprep.subr.mxu1 %v2164_v13 }
 0xab7   :  { %2591 = vmatpush3.msra.mxu1 %v2164_v13 }
 0xb3b   :  { %v2028_v46 = vpop.xlane.xlu0 %2027 }
 0xb3c   :  { %v2032_v1 = vmul.f32 0.03125, %v2028_v46 }
 0xb3e   :  { %v3046_v0 = vsub.f32 %v3037_v28, %v2032_v1 }
 0xb3f   :  { %v2031_v31 = vpop.xlane.xlu0 %2030 }
 0xb40   :  { %v2033_v32 = vmul.f32 0.03125, %v2031_v31  ;;  %v2036_v33 = vmul.f32 %v3046_v0, %v3046_v0 }
 0xb42   :  { %v3051_v47 = vsub.f32 %v3039_v29, %v2033_v32  ;;  %v2038_v48 = vsel %vm64_vm0, %v2036_v33, 0.0 }
 0xb43   :  { %2039 = vadd.xlane.f32.xlu0 %v2038_v48 }
 0xb44   :  { %v2037_v34 = vmul.f32 %v3051_v47, %v3051_v47 }
 0xb46   :  { %v2041_v35 = vsel %vm64_vm0, %v2037_v34, 0.0 }
 0xb47   :  { %2042 = vadd.xlane.f32.xlu1 %v2041_v35 }
 0xbcc   :  { %v2040_v59 = vpop.xlane.xlu0 %2039 }
 0xbcd   :  { %v2044_v60 = vmul.f32 0.03125, %v2040_v59 }
 0xbcf   :  { %v2046_v61 = vadd.f32 1e-05, %v2044_v60 }
 0xbd0   :  { %v2043_v62 = vpop.xlane.xlu1 %2042 }
 0xbd1   :  { %2640 = vrsqrt.f32 %v2046_v61  ;;  %v2045_v50 = vmul.f32 0.03125, %v2043_v62 }
 0xbd3   :  { %v2047_v63 = vadd.f32 1e-05, %v2045_v50 }
 0xbd5   :  { %2642 = vrsqrt.f32 %v2047_v63 }
 0xbde   :  { %v2641_v2 = vpop.eup %2640 }
 0xbdf   :  { %v2050_v4 = vmul.f32 %v2641_v2, %v3046_v0 }
 0xbe1   :  { %v2059_v54 = vmul.f32 %v2324_v3, %v2050_v4 }
 0xbe2   :  { %v2643_v6 = vpop.eup %2642 }
 0xbe3   :  { %v2051_v7 = vmul.f32 %v2643_v6, %v3051_v47  ;;  %v2068_v8 = vadd.f32 %v2325_v5, %v2059_v54 }
 0xbe5   :  { %v2060_v9 = vmul.f32 %v2324_v3, %v2051_v7  ;;  %2557 = vmatprep.mubr.msk.f32.mxu0 %vm64_vm0, %v2068_v8 }
 0xbe7   :  { %v2069_v49 = vadd.f32 %v2325_v5, %v2060_v9 }
 0xbe9   :  { %2558 = vmatmul.mubr.msk.f32.vlgmr.msra.gmra.mxu0 %vm64_vm0, %v2069_v49 }
 0xca9   :  { %v2559_v15 = vpop.f32.mrf.mxu0 }
 0xcaa   :  { %v2159_v16 = vadd.f32 %v2559_v15, %v2326_v14 }
 0xcab   :  { %v2153_v17 = vpop.f32.mrf.mxu0 }
 0xcac   :  { %v2154_v18 = vadd.f32 %v2326_v14, %v2153_v17  ;;  %v2163_v20 = vmax.f32 %v2159_v16, 0.0 }
 0xcae   :  { %v2162_v19 = vmax.f32 %v2154_v18, 0.0 }
 0xcb0   :  { %2592 = vmatprep.mubr.f32.mxu1 %v2162_v19 }
 0xcb1   :  { %2593 = vmatmul.mubr.f32.vlgmr.msra.gmra.mxu1 %v2163_v20 }
 0xd71   :  { %v2594_v22 = vpop.f32.mrf.mxu1 }
 0xd72   :  { %v2259_v23 = vadd.f32 %v2594_v22, %v2329_v21 }
 0xd73   :  { %v2253_v24 = vpop.f32.mrf.mxu1 }
 0xd74   :  { %v2263_v25 = vadd.f32 %v2259_v23, %v3039_v29  ;;  %v2254_v26 = vadd.f32 %v2329_v21, %v2253_v24 }
 0xd76   :  { %2265 = vst.msk [vmem:[#allocation5 + $0x8] sm:$0xff] %vm64_vm0, %v2263_v25  ;;  %v2262_v27 = vadd.f32 %v2254_v26, %v3037_v28 }
 0xd78   :  { %2264 = vst.msk [vmem:[#allocation5] sm:$0xff] %vm64_vm0, %v2262_v27 }
 0xd79   :  { %2675 = shalt.err (!%p2672_p9)
}
 0xd7a   :  { %2277 = dma.vmem_to_hbm [thread:$0]  %s2272_s5, 256, %s3157_s14, [#allocation4], %s2689_s16, %s2689_s16, %s2690_s17  }
 0xd7b   :  { %2686 = dma.done.wait [#allocation4], 256  }
 0xd7c   :  { %2687 = vsyncadd [#allocation4], 4294967040 }
 0xd7d   :  { %2281 = vsyncpa [#allocation3], 1 }
 0xd7e   :  { %2282 = vsyncpa [#allocation4], 1 }

</bundles_post_ra>
